<compile_context>
chip_gen: v7x
topology: tpu7x:2x2x1
jax: 0.10.0
libtpu: 0.0.40
codegen_flags: <defaults>
</compile_context>

<pallas_src>
import jax
import jax.numpy as jnp
from jax.experimental import pallas as pl
from jax.experimental.pallas import tpu as pltpu

HID1 = 128      # fc_mean first hidden width (fixed by DiagGaussian.__init__)
HID2 = 64       # fc_mean second hidden width
HEAD_PAD = 8    # head rows after sublane padding: row 0 = real 1-wide head, rows 1..7 = zeros


def _round_up(x, m):
    return (x + m - 1) // m * m


def diag_gaussian_kernel(xt_ref, w1_ref, b1_ref, w2_ref, b2_ref, w3_ref, b3_ref, out_ref):
    # Transposed orientation: batch is the lane axis everywhere, so the 1-wide head stays lane-dense.
    h1 = jnp.dot(w1_ref[...], xt_ref[...], preferred_element_type=jnp.float32) + b1_ref[...]
    h1 = jnp.maximum(h1, 0.0).astype(jnp.bfloat16)
    h2 = jnp.dot(w2_ref[...], h1, preferred_element_type=jnp.float32) + b2_ref[...]
    h2 = jnp.maximum(h2, 0.0).astype(jnp.bfloat16)
    z = jnp.dot(w3_ref[...], h2, preferred_element_type=jnp.float32) + b3_ref[...]
    # EUP work only on the useful row (not on the 7 padding rows), then sublane-broadcast so the
    # writeback is a full unmasked (HEAD_PAD, bm) tile.
    mean_row = jnp.tanh(jax.nn.sigmoid(z[0:1, :]))
    out_ref[...] = jnp.broadcast_to(mean_row, out_ref.shape).astype(out_ref.dtype)


def diag_gaussian_forward(x, params, *, bm=2048):
    """Returns (action_mean, action_std) of the Normal produced by DiagGaussian.forward."""
    w1, b1, w2, b2, w3, b3, logstd = params
    B, num_inputs = x.shape

    # Batch tile: multiple of 128 (batch is the lane axis), big enough to amortize grid-step
    # overhead, capped at ceil(B/2) so the grid has >= 2 steps whenever B > 128 (v7x megacore
    # needs grid >= 2 to use both TensorCores; neutral on single-TC v5e/v6e).
    bm_eff = min(_round_up(bm, 128), _round_up(-(-B // 2), 128))
    b_pad = _round_up(B, bm_eff)
    if b_pad != B:
        x = jnp.pad(x, ((0, b_pad - B), (0, 0)))  # padded columns give finite garbage, sliced off below

    # Cast + transpose fuse into a single XLA copy; batch becomes the lane-dense minor axis.
    xt = jnp.asarray(x.T, dtype=jnp.bfloat16)                                   # (num_inputs, b_pad)
    w1_t = w1.T.astype(jnp.bfloat16)                                            # (HID1, num_inputs)
    w2_t = w2.T.astype(jnp.bfloat16)                                            # (HID2, HID1)
    w3_t = jnp.zeros((HEAD_PAD, HID2), jnp.bfloat16).at[0, :].set(w3[:, 0].astype(jnp.bfloat16))
    b1_t = b1.reshape(HID1, 1).astype(jnp.float32)
    b2_t = b2.reshape(HID2, 1).astype(jnp.float32)
    b3_t = jnp.full((HEAD_PAD, 1), b3.reshape(()), jnp.float32)

    grid = (b_pad // bm_eff,)
    # VMEM budget per step (bm=2048): x tile 128 KiB x2 bufs, out tile 64 KiB x2, resident weights
    # ~40 KiB, f32/bf16 intermediates ~2.3 MiB -> well under the 32 MiB scoped default on v5e/v6e/v7x.
    out = pl.pallas_call(
        diag_gaussian_kernel,
        out_shape=jax.ShapeDtypeStruct((HEAD_PAD, b_pad), jnp.float32),
        grid_spec=pltpu.PrefetchScalarGridSpec(
            num_scalar_prefetch=0,
            grid=grid,
            in_specs=[
                pl.BlockSpec((num_inputs, bm_eff), lambda i: (0, i)),  # x^T tile (the only streamed input)
                pl.BlockSpec((HID1, num_inputs), lambda i: (0, 0)),    # W1^T (resident, constant idx)
                pl.BlockSpec((HID1, 1), lambda i: (0, 0)),             # b1 (column)
                pl.BlockSpec((HID2, HID1), lambda i: (0, 0)),          # W2^T
                pl.BlockSpec((HID2, 1), lambda i: (0, 0)),             # b2
                pl.BlockSpec((HEAD_PAD, HID2), lambda i: (0, 0)),      # W3^T (row 0 real, rest zero)
                pl.BlockSpec((HEAD_PAD, 1), lambda i: (0, 0)),         # b3
            ],
            out_specs=pl.BlockSpec((HEAD_PAD, bm_eff), lambda i: (0, i)),
        ),
        compiler_params=pltpu.CompilerParams(
            dimension_semantics=("parallel",),  # batch-tile axis shards across TCs on v7x only
        ),
    )(xt, w1_t, b1_t, w2_t, b2_t, w3_t, b3_t)

    action_mean = out[0, :B].reshape(B, 1)
    # action_logstd path: AddBias(logstd) on zeros -> tanh -> exp is data-independent; evaluate the
    # scalar transform once in the wrapper instead of burning VPU/EUP slots in the kernel.
    action_std = jnp.full((B, 1), jnp.exp(jnp.tanh(logstd.reshape(()))), jnp.float32)
    return action_mean, action_std


def init_params(key, num_inputs):
    # Deterministic synthetic init (orthogonal-like scale, zero bias) matching DiagGaussian's shapes.
    k1, k2, k3 = jax.random.split(key, 3)
    w1 = 0.01 * jax.random.normal(k1, (num_inputs, HID1), jnp.float32)
    b1 = jnp.zeros((1, HID1), jnp.float32)
    w2 = 0.01 * jax.random.normal(k2, (HID1, HID2), jnp.float32)
    b2 = jnp.zeros((1, HID2), jnp.float32)
    w3 = 0.01 * jax.random.normal(k3, (HID2, 1), jnp.float32)
    b3 = jnp.zeros((1, 1), jnp.float32)
    logstd = jnp.zeros((1,), jnp.float32)  # AddBias parameter (torch init: zeros)
    return (w1, b1, w2, b2, w3, b3, logstd)


def _reference_forward(x, params):
    # Pure-JAX reference with the same bf16-operand / f32-accumulate recipe as the kernel.
    w1, b1, w2, b2, w3, b3, logstd = params
    xb = x.astype(jnp.bfloat16)
    h1 = jnp.maximum(jnp.dot(xb, w1.astype(jnp.bfloat16),
                             preferred_element_type=jnp.float32) + b1, 0.0)
    h2 = jnp.maximum(jnp.dot(h1.astype(jnp.bfloat16), w2.astype(jnp.bfloat16),
                             preferred_element_type=jnp.float32) + b2, 0.0)
    z = jnp.dot(h2.astype(jnp.bfloat16), w3.astype(jnp.bfloat16),
                preferred_element_type=jnp.float32) + b3
    ref_mean = jnp.tanh(jax.nn.sigmoid(z))
    ref_std = jnp.exp(jnp.tanh(logstd)) * jnp.ones_like(ref_mean)
    return ref_mean, ref_std


if __name__ == "__main__":
    key = jax.random.PRNGKey(0)
    kx, kx2, kp = jax.random.split(key, 3)

    num_inputs = 32
    params = init_params(kp, num_inputs)

    # Small batch (non-multiple of 128) exercises the single-tile / ceil-pad path.
    batch = 12
    feature = jax.random.normal(kx, (batch, num_inputs), jnp.float32)
    mean, std = diag_gaussian_forward(feature, params)
    jax.block_until_ready((mean, std))

    ref_mean, ref_std = _reference_forward(feature, params)
    assert mean.shape == (batch, 1) and std.shape == (batch, 1)
    assert jnp.allclose(mean, ref_mean, atol=5e-3), "mean mismatch (small batch)"
    assert jnp.allclose(std, ref_std, atol=1e-5), "std mismatch (small batch)"

    # Larger batch exercises the multi-tile (grid >= 2) streaming path.
    batch2 = 300
    feature2 = jax.random.normal(kx2, (batch2, num_inputs), jnp.float32)
    mean2, std2 = diag_gaussian_forward(feature2, params)
    jax.block_until_ready((mean2, std2))

    ref_mean2, ref_std2 = _reference_forward(feature2, params)
    assert mean2.shape == (batch2, 1) and std2.shape == (batch2, 1)
    assert jnp.allclose(mean2, ref_mean2, atol=5e-3), "mean mismatch (multi-tile batch)"
    assert jnp.allclose(std2, ref_std2, atol=1e-5), "std mismatch (multi-tile batch)"

    # TODO(synk): the returned torch Normal's sample()/log_prob()/entropy() act on the distribution
    # object and are not part of forward(); only its parameters (mean, std) are computed here.
    print("KERNEL_OK")
</pallas_src>

<mosaic_0001>
module attributes {stable_mosaic.version = 11 : i64} {
  func.func @diag_gaussian_kernel(%arg0: i32, %arg1: memref<32x128xbf16, #tpu.memory_space<vmem>>, %arg2: memref<128x32xbf16, #tpu.memory_space<vmem>>, %arg3: memref<128x1xf32, #tpu.memory_space<vmem>>, %arg4: memref<64x128xbf16, #tpu.memory_space<vmem>>, %arg5: memref<64x1xf32, #tpu.memory_space<vmem>>, %arg6: memref<8x64xbf16, #tpu.memory_space<vmem>>, %arg7: memref<8x1xf32, #tpu.memory_space<vmem>>, %arg8: memref<8x128xf32, #tpu.memory_space<vmem>>) attributes {dimension_semantics = [#tpu.dimension_semantics<parallel>], iteration_bounds = array<i64: 1>, scalar_prefetch = 0 : i64, scratch_operands = 0 : i64, tpu.core_type = #tpu.core_type<tc>, window_params = [{transform_indices = @transform_0, window_bounds = array<i64: 32, 128>}, {pipeline_mode = #tpu.pipeline_mode<synchronous>, transform_indices = @transform_1, window_bounds = array<i64: 128, 32>}, {pipeline_mode = #tpu.pipeline_mode<synchronous>, transform_indices = @transform_2, window_bounds = array<i64: 128, 1>}, {pipeline_mode = #tpu.pipeline_mode<synchronous>, transform_indices = @transform_3, window_bounds = array<i64: 64, 128>}, {pipeline_mode = #tpu.pipeline_mode<synchronous>, transform_indices = @transform_4, window_bounds = array<i64: 64, 1>}, {pipeline_mode = #tpu.pipeline_mode<synchronous>, transform_indices = @transform_5, window_bounds = array<i64: 8, 64>}, {pipeline_mode = #tpu.pipeline_mode<synchronous>, transform_indices = @transform_6, window_bounds = array<i64: 8, 1>}, {transform_indices = @transform_7, window_bounds = array<i64: 8, 128>}]} {
    %c0 = arith.constant 0 : index
    %c0_0 = arith.constant 0 : index
    %0 = vector.load %arg2[%c0, %c0_0] : memref<128x32xbf16, #tpu.memory_space<vmem>>, vector<128x32xbf16>
    %c0_1 = arith.constant 0 : index
    %c0_2 = arith.constant 0 : index
    %1 = vector.load %arg1[%c0_1, %c0_2] : memref<32x128xbf16, #tpu.memory_space<vmem>>, vector<32x128xbf16>
    %cst = arith.constant dense<0.000000e+00> : vector<128x128xf32>
    %2 = tpu.matmul %0, %1, %cst {dimension_numbers = #tpu.dot_dimension_numbers<[1], [0], [0], [1], [0, 0, 1, 1], [], []>} : vector<128x32xbf16>, vector<32x128xbf16>, vector<128x128xf32> -> vector<128x128xf32>
    %c0_3 = arith.constant 0 : index
    %c0_4 = arith.constant 0 : index
    %3 = vector.load %arg3[%c0_3, %c0_4] : memref<128x1xf32, #tpu.memory_space<vmem>>, vector<128x1xf32>
    %4 = vector.broadcast %3 : vector<128x1xf32> to vector<128x128xf32>
    %5 = arith.addf %2, %4 : vector<128x128xf32>
    %cst_5 = arith.constant 0.000000e+00 : f32
    %6 = vector.broadcast %cst_5 : f32 to vector<128x128xf32>
    %7 = arith.maximumf %5, %6 : vector<128x128xf32>
    %8 = arith.truncf %7 : vector<128x128xf32> to vector<128x128xbf16>
    %c0_6 = arith.constant 0 : index
    %c0_7 = arith.constant 0 : index
    %9 = vector.load %arg4[%c0_6, %c0_7] : memref<64x128xbf16, #tpu.memory_space<vmem>>, vector<64x128xbf16>
    %cst_8 = arith.constant dense<0.000000e+00> : vector<64x128xf32>
    %10 = tpu.matmul %9, %8, %cst_8 {dimension_numbers = #tpu.dot_dimension_numbers<[1], [0], [0], [1], [0, 0, 1, 1], [], []>} : vector<64x128xbf16>, vector<128x128xbf16>, vector<64x128xf32> -> vector<64x128xf32>
    %c0_9 = arith.constant 0 : index
    %c0_10 = arith.constant 0 : index
    %11 = vector.load %arg5[%c0_9, %c0_10] : memref<64x1xf32, #tpu.memory_space<vmem>>, vector<64x1xf32>
    %12 = vector.broadcast %11 : vector<64x1xf32> to vector<64x128xf32>
    %13 = arith.addf %10, %12 : vector<64x128xf32>
    %cst_11 = arith.constant 0.000000e+00 : f32
    %14 = vector.broadcast %cst_11 : f32 to vector<64x128xf32>
    %15 = arith.maximumf %13, %14 : vector<64x128xf32>
    %16 = arith.truncf %15 : vector<64x128xf32> to vector<64x128xbf16>
    %c0_12 = arith.constant 0 : index
    %c0_13 = arith.constant 0 : index
    %17 = vector.load %arg6[%c0_12, %c0_13] : memref<8x64xbf16, #tpu.memory_space<vmem>>, vector<8x64xbf16>
    %cst_14 = arith.constant dense<0.000000e+00> : vector<8x128xf32>
    %18 = tpu.matmul %17, %16, %cst_14 {dimension_numbers = #tpu.dot_dimension_numbers<[1], [0], [0], [1], [0, 0, 1, 1], [], []>} : vector<8x64xbf16>, vector<64x128xbf16>, vector<8x128xf32> -> vector<8x128xf32>
    %c0_15 = arith.constant 0 : index
    %c0_16 = arith.constant 0 : index
    %19 = vector.load %arg7[%c0_15, %c0_16] : memref<8x1xf32, #tpu.memory_space<vmem>>, vector<8x1xf32>
    %20 = vector.broadcast %19 : vector<8x1xf32> to vector<8x128xf32>
    %21 = arith.addf %18, %20 : vector<8x128xf32>
    %22 = vector.extract_strided_slice %21 {offsets = [0, 0], sizes = [1, 128], strides = [1, 1]} : vector<8x128xf32> to vector<1x128xf32>
    %23 = arith.negf %22 : vector<1x128xf32>
    %24 = math.exp %23 : vector<1x128xf32>
    %cst_17 = arith.constant 1.000000e+00 : f32
    %25 = vector.broadcast %cst_17 : f32 to vector<1x128xf32>
    %26 = arith.addf %25, %24 : vector<1x128xf32>
    %27 = arith.divf %25, %26 : vector<1x128xf32>
    %28 = math.tanh %27 : vector<1x128xf32>
    %29 = vector.shape_cast %28 : vector<1x128xf32> to vector<1x128xf32>
    %30 = vector.broadcast %29 : vector<1x128xf32> to vector<8x128xf32>
    %c0_18 = arith.constant 0 : index
    %c0_19 = arith.constant 0 : index
    %31 = vector.load %arg8[%c0_18, %c0_19] : memref<8x128xf32, #tpu.memory_space<vmem>>, vector<8x128xf32>
    tpu.vector_store %arg8[%c0_18, %c0_19], %30 {strides = array<i32>} : memref<8x128xf32, #tpu.memory_space<vmem>>, vector<8x128xf32>,
    return
  }
  func.func @transform_0(%arg0: i32) -> (i32, i32) {
    %c0_i32 = arith.constant 0 : i32
    %c0_i32_0 = arith.constant 0 : i32
    return %c0_i32, %arg0 : i32, i32
  }
  func.func @transform_1(%arg0: i32) -> (i32, i32) {
    %c0_i32 = arith.constant 0 : i32
    %c0_i32_0 = arith.constant 0 : i32
    %c0_i32_1 = arith.constant 0 : i32
    return %c0_i32, %c0_i32_0 : i32, i32
  }
  func.func @transform_2(%arg0: i32) -> (i32, i32) {
    %c0_i32 = arith.constant 0 : i32
    %c0_i32_0 = arith.constant 0 : i32
    %c0_i32_1 = arith.constant 0 : i32
    return %c0_i32, %c0_i32_0 : i32, i32
  }
  func.func @transform_3(%arg0: i32) -> (i32, i32) {
    %c0_i32 = arith.constant 0 : i32
    %c0_i32_0 = arith.constant 0 : i32
    %c0_i32_1 = arith.constant 0 : i32
    return %c0_i32, %c0_i32_0 : i32, i32
  }
  func.func @transform_4(%arg0: i32) -> (i32, i32) {
    %c0_i32 = arith.constant 0 : i32
    %c0_i32_0 = arith.constant 0 : i32
    %c0_i32_1 = arith.constant 0 : i32
    return %c0_i32, %c0_i32_0 : i32, i32
  }
  func.func @transform_5(%arg0: i32) -> (i32, i32) {
    %c0_i32 = arith.constant 0 : i32
    %c0_i32_0 = arith.constant 0 : i32
    %c0_i32_1 = arith.constant 0 : i32
    return %c0_i32, %c0_i32_0 : i32, i32
  }
  func.func @transform_6(%arg0: i32) -> (i32, i32) {
    %c0_i32 = arith.constant 0 : i32
    %c0_i32_0 = arith.constant 0 : i32
    %c0_i32_1 = arith.constant 0 : i32
    return %c0_i32, %c0_i32_0 : i32, i32
  }
  func.func @transform_7(%arg0: i32) -> (i32, i32) {
    %c0_i32 = arith.constant 0 : i32
    %c0_i32_0 = arith.constant 0 : i32
    return %c0_i32, %arg0 : i32, i32
  }
}

</mosaic_0001>

<bundles_post_ra>
// kernel: tpu_custom_call.1
= control target key start
LH: loop header
LB: loop body
LE: loop exit
PB: predicated region body
PF: predicated region fallthrough
CT: control target
= control target key end

     0   :  { %vm196_vm0 = vcmask 261120   ;;  %v733_v3 = vmov 0   ;;  %s917_s0 = inlined_call_operand.vmem [shape: bf16[32,128], index: 0, kind: input, shape index: {}]   ;;  %s918_s1 = inlined_call_operand.vmem [shape: bf16[128,32], index: 1, kind: input, shape index: {}]   ;;  %s919_s2 = inlined_call_operand.vmem [shape: f32[128,1], index: 2, kind: input, shape index: {}]   ;;  %s920_s3 = inlined_call_operand.vmem [shape: bf16[64,128], index: 3, kind: input, shape index: {}]   ;;  %s921_s4 = inlined_call_operand.vmem [shape: f32[64,1], index: 4, kind: input, shape index: {}]   ;;  %s922_s5 = inlined_call_operand.vmem [shape: bf16[8,64], index: 5, kind: input, shape index: {}]   ;;  %s923_s6 = inlined_call_operand.vmem [shape: f32[8,1], index: 6, kind: input, shape index: {}]   ;;  %s924_s7 = inlined_call_operand.hbm [shape: f32[8,128], index: 7, kind: output, shape index: {}]  }
   0x1   :  { %v689_v0 = vld [vmem:[%s917_s0] sm:$0xff]   ;;  %v690_v1 = vld [vmem:[%s917_s0 + $0x8] sm:$0xff]   ;;  %687 = vset.pattern.permute.xlu0 %v733_v3  ;;  %688 = vset.pattern.permute.xlu1 %v733_v3  ;;  %v693_v5 = vld [vmem:[%s918_s1 + $0x10] sm:$0xff]  }
   0x2   :  { %627 = vmatprep.subr.bf16.mxu0 %v689_v0  ;;  %v691_v2 = vld [vmem:[%s918_s1] sm:$0xff]   ;;  %v692_v4 = vld [vmem:[%s918_s1 + $0x8] sm:$0xff]   ;;  %v50_v7 = vld [vmem:[%s919_s2 + $0x10] sm:$0xff] }
   0x3   :  { %628 = vmatpush3.bf16.msra.mxu0 %v689_v0  ;;  %631 = vmatprep.mubr.msk.bf16.mxu0 %vm196_vm0, %v691_v2  ;;  %v48_v6 = vld [vmem:[%s919_s2] sm:$0xff]  ;;  %v49_v8 = vld [vmem:[%s919_s2 + $0x8] sm:$0xff]  ;;  %v51_v9 = vld [vmem:[%s919_s2 + $0x18] sm:$0xff] }
   0x4   :  { %629 = vmatprep.subr.bf16.mxu0 %v690_v1  ;;  %66 = vperm.xlu0 %687, %v48_v6   ;;  %v694_v10 = vld [vmem:[%s918_s1 + $0x18] sm:$0xff]   ;;  %v695_v11 = vld [vmem:[%s918_s1 + $0x20] sm:$0xff]   ;;  %v53_v13 = vld [vmem:[%s919_s2 + $0x28] sm:$0xff] }
   0x5   :  { %76 = vperm.xlu1 %688, %v50_v7   ;;  %v52_v12 = vld [vmem:[%s919_s2 + $0x20] sm:$0xff]  ;;  %v54_v14 = vld [vmem:[%s919_s2 + $0x30] sm:$0xff]  ;;  %v55_v15 = vld [vmem:[%s919_s2 + $0x38] sm:$0xff] }
   0x7   :  { %630 = vmatpush3.bf16.msra.mxu0 %v690_v1 }
   0x8   :  { %71 = vperm.xlu0 %687, %v49_v8  }
   0x9   :  { %81 = vperm.xlu1 %688, %v51_v9  }
   0xa   :  { %632 = vmatmul.mubr.msk.bf16.vlgmr.msra.gmra.mrb[0].mxu0 %vm196_vm0, %v692_v4 }
   0xb   :  { %635 = vmatprep.mubr.msk.bf16.mxu0 %vm196_vm0, %v693_v5 }
   0xc   :  { %86 = vperm.xlu0 %687, %v52_v12  }
   0xd   :  { %91 = vperm.xlu1 %688, %v53_v13  }
  0x12   :  { %636 = vmatmul.mubr.msk.bf16.gmra.mrb[4].mxu0 %vm196_vm0, %v694_v10 }
  0x13   :  { %639 = vmatprep.mubr.msk.bf16.mxu0 %vm196_vm0, %v695_v11 }
  0x14   :  { %12 = vsyncpa [#allocation3], 0  ;;  %v696_v16 = vld [vmem:[%s918_s1 + $0x28] sm:$0xff]   ;;  %v697_v17 = vld [vmem:[%s918_s1 + $0x30] sm:$0xff]   ;;  %96 = vperm.xlu0 %687, %v54_v14   ;;  %101 = vperm.xlu1 %688, %v55_v15   ;;  %vm735_vm1 = vmmov 0   ;;  %vm506_vm2 = vcmask 523264  }
  0x15   :  { %v56_v18 = vld [vmem:[%s919_s2 + $0x40] sm:$0xff]  ;;  %v57_v19 = vld [vmem:[%s919_s2 + $0x48] sm:$0xff]  ;;  %v58_v20 = vld [vmem:[%s919_s2 + $0x50] sm:$0xff] }
  0x16   :  { %v59_v21 = vld [vmem:[%s919_s2 + $0x58] sm:$0xff]  ;;  %v60_v23 = vld [vmem:[%s919_s2 + $0x60] sm:$0xff]  ;;  %v61_v24 = vld [vmem:[%s919_s2 + $0x68] sm:$0xff] }
  0x17   :  { %v698_v22 = vld [vmem:[%s918_s1 + $0x38] sm:$0xff]   ;;  %v62_v25 = vld [vmem:[%s919_s2 + $0x70] sm:$0xff]  ;;  %v350_v27 = vld [vmem:[%s921_s4] sm:$0xff]  ;;  %s736_s1 = smov [#allocation2]  }
  0x18   :  { %106 = vperm.xlu0 %687, %v56_v18   ;;  %111 = vperm.xlu1 %688, %v57_v19   ;;  %v63_v26 = vld [vmem:[%s919_s2 + $0x78] sm:$0xff]  ;;  %v351_v28 = vld [vmem:[%s921_s4 + $0x8] sm:$0xff]  ;;  %v352_v29 = vld [vmem:[%s921_s4 + $0x10] sm:$0xff] }
  0x19   :  { %v353_v30 = vld [vmem:[%s921_s4 + $0x18] sm:$0xff]  ;;  %v354_v31 = vld [vmem:[%s921_s4 + $0x20] sm:$0xff]  ;;  %v355_v32 = vld [vmem:[%s921_s4 + $0x28] sm:$0xff] }
  0x1a   :  { %640 = vmatmul.mubr.msk.bf16.gmra.mrb[8].mxu0 %vm196_vm0, %v696_v16  ;;  %v356_v33 = vld [vmem:[%s921_s4 + $0x30] sm:$0xff]  ;;  %v357_v34 = vld [vmem:[%s921_s4 + $0x38] sm:$0xff]  ;;  %v500_v35 = vld [vmem:[%s923_s6] sm:$0xff] }
  0x1b   :  { %643 = vmatprep.mubr.msk.bf16.mxu0 %vm196_vm0, %v697_v17  ;;  %v699_v36 = vld [vmem:[%s920_s3] sm:$0xff]  }
  0x1c   :  { %116 = vperm.xlu0 %687, %v58_v20   ;;  %121 = vperm.xlu1 %688, %v59_v21  }
  0x1d   :  { %663 = vmatprep.mubr.bf16.mxu1 %v699_v36 }
  0x20   :  { %126 = vperm.xlu0 %687, %v60_v23   ;;  %131 = vperm.xlu1 %688, %v61_v24  }
  0x22   :  { %644 = vmatmul.mubr.msk.bf16.gmra.mrb[12].mxu0 %vm196_vm0, %v698_v22 }
  0x24   :  { %136 = vperm.xlu0 %687, %v62_v25   ;;  %141 = vperm.xlu1 %688, %v63_v26  }
  0x28   :  { %360 = vperm.xlu0 %687, %v350_v27   ;;  %365 = vperm.xlu1 %688, %v351_v28  }
  0x2c   :  { %370 = vperm.xlu0 %687, %v352_v29   ;;  %375 = vperm.xlu1 %688, %v353_v30  }
  0x30   :  { %380 = vperm.xlu0 %687, %v354_v31   ;;  %385 = vperm.xlu1 %688, %v355_v32  }
  0x34   :  { %390 = vperm.xlu0 %687, %v356_v33   ;;  %395 = vperm.xlu1 %688, %v357_v34  }
  0x38   :  { %503 = vperm.xlu0 %687, %v500_v35  }
  0x83   :  { %v67_v37 = vpop.permute.xlu0 %66 }
  0x84   :  { %v77_v38 = vpop.permute.xlu1 %76 }
  0x87   :  { %v72_v39 = vpop.permute.xlu0 %71 }
  0x88   :  { %v82_v40 = vpop.permute.xlu1 %81 }
  0x8b   :  { %v87_v41 = vpop.permute.xlu0 %86 }
  0x8c   :  { %v92_v42 = vpop.permute.xlu1 %91 }
  0x93   :  { %v97_v43 = vpop.permute.xlu0 %96  ;;  %v102_v47 = vpop.permute.xlu1 %101 }
  0x97   :  { %v107_v55 = vpop.permute.xlu0 %106  ;;  %v112_v59 = vpop.permute.xlu1 %111 }
  0x9b   :  { %v117_v4 = vpop.permute.xlu0 %116  ;;  %v122_v8 = vpop.permute.xlu1 %121 }
  0x9f   :  { %v127_v16 = vpop.permute.xlu0 %126  ;;  %v132_v21 = vpop.permute.xlu1 %131 }
  0xa3   :  { %v137_v28 = vpop.permute.xlu0 %136  ;;  %v142_v33 = vpop.permute.xlu1 %141 }
  0xdd   :  { %v633_v44 = vpop.f32.mrb[0].mxu0 }
  0xde   :  { %v264_v45 = vadd.f32 %v633_v44, %v77_v38  ;;  %v255_v46 = vpop.f32.mrb[1].mxu0 }
  0xdf   :  { %v256_v48 = vadd.f32 %v255_v46, %v67_v37  ;;  %v634_v49 = vpop.f32.mrb[2].mxu0  ;;  %v701_v46 = vld [vmem:[%s920_s3 + $0x10] sm:$0xff]  }
  0xe0   :  { %v267_v50 = vadd.f32 %v634_v49, %v82_v40  ;;  %v258_v51 = vpop.f32.mrb[3].mxu0  ;;  %v320_v53 = vmax.f32 %v264_v45, 0.0  ;;  %v700_v45 = vld [vmem:[%s920_s3 + $0x8] sm:$0xff]   ;;  %v361_v49 = vpop.permute.xlu0 %360 }
  0xe1   :  { %v259_v52 = vadd.f32 %v258_v51, %v72_v39  ;;  %v318_v56 = vmax.f32 %v256_v48, 0.0  ;;  %v734_v48 = vmov 0.0  }
  0xe2   :  { %v321_v54 = vmax.f32 %v267_v50, 0.0  ;;  %671 = vmatprep.subr.bf16.mxu0 %v734_v48  ;;  %679 = vmatprep.mubr.msk.bf16.mxu0 %vm735_vm1, %v734_v48  ;;  %v366_v50 = vpop.permute.xlu1 %365 }
  0xe3   :  { %v319_v57 = vmax.f32 %v259_v52, 0.0 }
  0xe4   :  { %v335_v58 = vpack.c.bf16 %v321_v54, %v320_v53  ;;  %v371_v51 = vpop.permute.xlu0 %370 }
  0xe5   :  { %v637_v60 = vpop.f32.mrb[4].mxu0  ;;  %v334_v61 = vpack.c.bf16 %v319_v57, %v318_v56 }
  0xe6   :  { %v280_v62 = vadd.f32 %v637_v60, %v97_v43  ;;  %v271_v63 = vpop.f32.mrb[5].mxu0  ;;  %v376_v52 = vpop.permute.xlu1 %375 }
  0xe7   :  { %v272_v0 = vadd.f32 %v271_v63, %v87_v41  ;;  %v638_v1 = vpop.f32.mrb[6].mxu0  ;;  %647 = vmatprep.subr.bf16.mxu1 %v334_v61 }
  0xe8   :  { %v283_v2 = vadd.f32 %v638_v1, %v102_v47  ;;  %v274_v3 = vpop.f32.mrb[7].mxu0  ;;  %648 = vmatpush3.bf16.msra.mxu1 %v334_v61  ;;  %v324_v6 = vmax.f32 %v280_v62, 0.0  ;;  %v702_v47 = vld [vmem:[%s920_s3 + $0x18] sm:$0xff]   ;;  %v381_v56 = vpop.permute.xlu0 %380 }
  0xe9   :  { %v275_v5 = vadd.f32 %v274_v3, %v92_v42  ;;  %649 = vmatprep.subr.bf16.mxu1 %v335_v58  ;;  %v322_v9 = vmax.f32 %v272_v0, 0.0 }
  0xea   :  { %v325_v7 = vmax.f32 %v283_v2, 0.0  ;;  %v386_v61 = vpop.permute.xlu1 %385 }
  0xeb   :  { %v323_v10 = vmax.f32 %v275_v5, 0.0 }
  0xec   :  { %v337_v11 = vpack.c.bf16 %v325_v7, %v324_v6  ;;  %650 = vmatpush3.bf16.msra.mxu1 %v335_v58 }
  0xed   :  { %v336_v12 = vpack.c.bf16 %v323_v10, %v322_v9  ;;  %v641_v13 = vpop.f32.mrb[8].mxu0 }
  0xee   :  { %v296_v14 = vadd.f32 %v641_v13, %v117_v4  ;;  %v287_v15 = vpop.f32.mrb[9].mxu0  ;;  %v391_v4 = vpop.permute.xlu0 %390 }
  0xef   :  { %v288_v17 = vadd.f32 %v287_v15, %v107_v55  ;;  %v642_v18 = vpop.f32.mrb[10].mxu0  ;;  %651 = vmatprep.subr.bf16.mxu1 %v336_v12  ;;  %v396_v9 = vpop.permute.xlu1 %395 }
  0xf0   :  { %v299_v19 = vadd.f32 %v642_v18, %v122_v8  ;;  %v290_v20 = vpop.f32.mrb[11].mxu0  ;;  %652 = vmatpush3.bf16.msra.mxu1 %v336_v12  ;;  %v328_v23 = vmax.f32 %v296_v14, 0.0 }
  0xf1   :  { %v291_v22 = vadd.f32 %v290_v20, %v112_v59  ;;  %653 = vmatprep.subr.bf16.mxu1 %v337_v11  ;;  %v326_v25 = vmax.f32 %v288_v17, 0.0 }
  0xf2   :  { %v329_v24 = vmax.f32 %v299_v19, 0.0 }
  0xf3   :  { %v327_v26 = vmax.f32 %v291_v22, 0.0  ;;  %v504_v22 = vpop.permute.xlu0 %503 }
  0xf4   :  { %v339_v27 = vpack.c.bf16 %v329_v24, %v328_v23  ;;  %654 = vmatpush3.bf16.msra.mxu1 %v337_v11 }
  0xf5   :  { %v338_v29 = vpack.c.bf16 %v327_v26, %v326_v25  ;;  %v645_v30 = vpop.f32.mrb[12].mxu0 }
  0xf6   :  { %v312_v31 = vadd.f32 %v645_v30, %v137_v28  ;;  %v303_v32 = vpop.f32.mrb[13].mxu0 }
  0xf7   :  { %v304_v34 = vadd.f32 %v303_v32, %v127_v16  ;;  %v646_v35 = vpop.f32.mrb[14].mxu0  ;;  %655 = vmatprep.subr.bf16.mxu1 %v338_v29  ;;  %v557_v32 = vlaneseq }
  0xf8   :  { %v315_v36 = vadd.f32 %v646_v35, %v142_v33  ;;  %v306_v37 = vpop.f32.mrb[15].mxu0  ;;  %656 = vmatpush3.bf16.msra.mxu1 %v338_v29  ;;  %v332_v39 = vmax.f32 %v312_v31, 0.0 }
  0xf9   :  { %v307_v38 = vadd.f32 %v306_v37, %v132_v21  ;;  %657 = vmatprep.subr.bf16.mxu1 %v339_v27  ;;  %v330_v41 = vmax.f32 %v304_v34, 0.0  ;;  %v499_v21 = vld [vmem:[%s922_s5] sm:$0xf]  ;;  %v558_v33 = vshrl.u32 %v557_v32, 7  ;;  %s568_s5 = sshll.u32 %s736_s1, 4  ;;  %s569_s5 = int_to_ptr.vmem [resolvable:$true] %s568_s5 }
  0xfa   :  { %v333_v40 = vmax.f32 %v315_v36, 0.0  ;;  %s709_s27 = scalar_lea.vmem %s569_s5, 128  ;;  %p714_p1 = scmp.lt.s32.totalorder %s569_s5, %s569_s5 }
  0xfb   :  { %v331_v42 = vmax.f32 %v307_v38, 0.0  ;;  %v559_v34 = vsub.s32 0, %v558_v33  ;;  %p710_p0 = scmp.ne.s32.totalorder %s569_s5, %s709_s27  ;;  %p715_p2 = scmp.lt.s32.totalorder %s709_s27, %s709_s27 }
  0xfc   :  { %v341_v43 = vpack.c.bf16 %v333_v40, %v332_v39  ;;  %658 = vmatpush3.bf16.msra.mxu1 %v339_v27 }
  0xfd   :  { %v340_v44 = vpack.c.bf16 %v331_v42, %v330_v41  ;;  %p716_p3 = por %p715_p2, %p714_p1 }
  0xff   :  { %659 = vmatprep.subr.bf16.mxu1 %v340_v44  ;;  %p717_p4 = pnand %p716_p3, %p710_p0 }
 0x100   :  { %660 = vmatpush3.bf16.msra.mxu1 %v340_v44 }
 0x101   :  { %661 = vmatprep.subr.bf16.mxu1 %v341_v43 }
 0x104   :  { %662 = vmatpush3.bf16.msra.mxu1 %v341_v43 }
 0x107   :  { %664 = vmatmul.mubr.bf16.vlgmr.msra.gmra.mrb[0].mxu1 %v700_v45 }
 0x108   :  { %667 = vmatprep.mubr.bf16.mxu1 %v701_v46 }
 0x10f   :  { %668 = vmatmul.mubr.bf16.gmra.mrb[4].mxu1 %v702_v47 }
 0x1da   :  { %v665_v53 = vpop.f32.mrb[0].mxu1 }
 0x1db   :  { %v465_v54 = vadd.f32 %v665_v53, %v371_v51  ;;  %v456_v55 = vpop.f32.mrb[1].mxu1 }
 0x1dc   :  { %v457_v57 = vadd.f32 %v456_v55, %v361_v49  ;;  %v666_v58 = vpop.f32.mrb[2].mxu1 }
 0x1dd   :  { %v468_v59 = vadd.f32 %v666_v58, %v376_v52  ;;  %v459_v60 = vpop.f32.mrb[3].mxu1  ;;  %v489_v63 = vmax.f32 %v465_v54, 0.0 }
 0x1de   :  { %v460_v62 = vadd.f32 %v459_v60, %v366_v50  ;;  %v487_v1 = vmax.f32 %v457_v57, 0.0 }
 0x1df   :  { %v490_v0 = vmax.f32 %v468_v59, 0.0 }
 0x1e0   :  { %v488_v2 = vmax.f32 %v460_v62, 0.0 }
 0x1e1   :  { %v496_v3 = vpack.c.bf16 %v490_v0, %v489_v63 }
 0x1e2   :  { %v495_v5 = vpack.c.bf16 %v488_v2, %v487_v1  ;;  %v669_v6 = vpop.f32.mrb[4].mxu1 }
 0x1e3   :  { %v481_v7 = vadd.f32 %v669_v6, %v391_v4  ;;  %v472_v8 = vpop.f32.mrb[5].mxu1 }
 0x1e4   :  { %v473_v10 = vadd.f32 %v472_v8, %v381_v56  ;;  %v670_v11 = vpop.f32.mrb[6].mxu1  ;;  %672 = vmatpush3.bf16.msra.mxu0 %v495_v5 }
 0x1e5   :  { %v484_v12 = vadd.f32 %v670_v11, %v396_v9  ;;  %v475_v13 = vpop.f32.mrb[7].mxu1  ;;  %673 = vmatprep.subr.bf16.mxu0 %v734_v48  ;;  %v493_v15 = vmax.f32 %v481_v7, 0.0 }
 0x1e6   :  { %v476_v14 = vadd.f32 %v475_v13, %v386_v61  ;;  %v491_v17 = vmax.f32 %v473_v10, 0.0 }
 0x1e7   :  { %v494_v16 = vmax.f32 %v484_v12, 0.0 }
 0x1e8   :  { %v492_v18 = vmax.f32 %v476_v14, 0.0  ;;  %674 = vmatpush3.bf16.msra.mxu0 %v496_v3 }
 0x1e9   :  { %v498_v19 = vpack.c.bf16 %v494_v16, %v493_v15  ;;  %675 = vmatprep.subr.bf16.mxu0 %v734_v48 }
 0x1ea   :  { %v497_v20 = vpack.c.bf16 %v492_v18, %v491_v17 }
 0x1ec   :  { %676 = vmatpush3.bf16.msra.mxu0 %v497_v20 }
 0x1ed   :  { %677 = vmatprep.subr.bf16.mxu0 %v734_v48 }
 0x1f0   :  { %678 = vmatpush3.bf16.msra.mxu0 %v498_v19 }
 0x1f3   :  { %680 = vmatmul.mubr.msk.bf16.vlgmr.msra.gmra.mrb[16].mxu0 %vm506_vm2, %v499_v21 }
 0x2c6   :  { %v544_v23 = vpop.f32.mrb[16].mxu0 }
 0x2c7   :  { %v545_v24 = vadd.f32 %v544_v23, %v504_v22  ;;  %v681_v25 = vpop.f32.mrb[17].mxu0 }
 0x2c8   :  { %v547_v26 = vpop.f32.mrb[18].mxu0 }
 0x2c9   :  { %v599_v27 = vmul.f32 -1.442695, %v545_v24  ;;  %v682_v28 = vpop.f32.mrb[19].mxu0 }
 0x2cb   :  { %703 = vpow2.f32 %v599_v27 }
 0x2d5   :  { %v704_v29 = vpop.eup %703 }
 0x2d6   :  { %v553_v30 = vadd.f32 1.0, %v704_v29 }
 0x2d8   :  { %705 = vrcp.f32 %v553_v30 }
 0x2e2   :  { %v706_v31 = vpop.eup %705 }
 0x2e3   :  { %707 = vtanh.f32 %v706_v31 }
 0x2ed   :  { %v708_v35 = vpop.eup %707 }
 0x2ee   :  { %v560_v36 = vrot.slane %v708_v35, %v559_v34 }
 0x2f0   :  { %561 = vst [vmem:[#allocation2] sm:$0xff] %v560_v36 }
 0x2f1   :  { %720 = shalt.err (!%p717_p4)
}
 0x2f2   :  { %s721_s30 = scalar_lea.hbm %s924_s7, 128 }
 0x2f3   :  { %p722_p5 = scmp.ne.s32.totalorder %s924_s7, %s721_s30  ;;  %p725_p6 = scmp.lt.u32.totalorder %s721_s30, %s924_s7 }
 0x2f5   :  { %p727_p7 = pnand %p725_p6, %p722_p5 }
 0x2f7   :  { %730 = shalt.err (!%p727_p7)
}
 0x2f8   :  { %571 = dma.vmem_to_hbm [thread:$0]  %s569_s5, 128, %s924_s7, [#allocation3]  }
 0x2f9   :  { %731 = dma.done.wait [#allocation3], 128  }
 0x2fa   :  { %732 = vsyncadd [#allocation3], 4294967168 }
 0x2fb   :  { %575 = vsyncpa [#allocation3], 1 }

</bundles_post_ra>
